<compile_context>
chip_gen: v6e
topology: v6e:2x2x1
jax: 0.10.0
libtpu: 0.0.40
codegen_flags: <defaults>
</compile_context>

<pallas_src>
import functools
import math

import jax
import jax.numpy as jnp
from jax import lax
from jax.experimental import pallas as pl
from jax.experimental.pallas import tpu as pltpu

OPTIMAL_GAUSSIAN_SCALES = {
    1: 0.7978845587140913, 1.585: 1.2240089519030855, 2: 1.4935346200015913,
    3: 2.051068354131873, 4: 2.513930578568423, 5: 2.9160938834961225,
    6: 3.276597282593217, 7: 3.6010497188221655, 8: 3.884938678807525,
}

BITS = 4
N_LEVELS = 2 ** BITS
GAUSS = OPTIMAL_GAUSSIAN_SCALES[BITS]
HALF_Q = (N_LEVELS - 1) / 2.0                 # clip bound in normalized domain
EPS = 1e-8
EPS2 = (EPS / GAUSS) ** 2                     # epsilon moved inside the sqrt
C_INV = (N_LEVELS - 1) / (2.0 * GAUSS)        # inv_step = C_INV * rsqrt(mean+EPS2)
C_STEP = 2.0 * GAUSS / (N_LEVELS - 1)         # step     = C_STEP * sqrt(mean+EPS2)

# Fallback threshold: each one-hot packing matrix is (p*W, p) f32.
_MAX_ONEHOT_BYTES = 2 << 20


def _quantize_normalized(x, inv_b, step_b, out_dtype):
    # t = x/step clipped to +/-(N-1)/2 ; xq = (round(t + 1/2) - 1/2) * step
    t = jnp.clip(x * inv_b, -HALF_Q, HALF_Q)
    return ((jnp.round(t + 0.5) - 0.5) * step_b).astype(out_dtype)


def _packed_kernel(x_ref, seg_ref, segt_ref, o_ref, *, seg_width):
    # x_ref block: (TR, PW), PW a multiple of 128; each packed row holds
    # NSEG = PW // seg_width independent reduction segments of width seg_width.
    x = x_ref[...].astype(jnp.float32)                                   # (TR, PW)

    # Segmented cross-lane sum(x^2) via one-hot matmul on the MXU.
    seg_sum = jnp.dot(x * x, seg_ref[...],
                      preferred_element_type=jnp.float32)                # (TR, NSEG)
    mean = seg_sum * (1.0 / seg_width) + EPS2
    r = lax.rsqrt(mean)                                                  # EUP, lane-sparse
    inv_step = C_INV * r                                                 # (TR, NSEG)
    step = C_STEP * (mean * r)                                           # = C_STEP*sqrt(mean)

    # Broadcast per-segment scalars back across their seg_width lanes (MXU).
    inv_b = jnp.dot(inv_step, segt_ref[...], preferred_element_type=jnp.float32)
    step_b = jnp.dot(step, segt_ref[...], preferred_element_type=jnp.float32)

    o_ref[...] = _quantize_normalized(x, inv_b, step_b, o_ref.dtype)


def _rowwise_kernel(x_ref, o_ref):
    # Fallback: block (TR, W) with W the full last axis; reduce on VPU/XLU.
    x = x_ref[...].astype(jnp.float32)                                   # (TR, W)
    mean = jnp.mean(x * x, axis=-1, keepdims=True) + EPS2                # (TR, 1)
    r = lax.rsqrt(mean)
    inv_step = C_INV * r
    step = C_STEP * (mean * r)
    o_ref[...] = _quantize_normalized(x, inv_step, step, o_ref.dtype)


def _pick_row_tile(n_rows, row_bytes, target_block_bytes):
    """Multiple-of-8 row tile near target_block_bytes with >=2 grid steps when possible."""
    if n_rows <= 8:
        return n_rows
    tile = max(8, (target_block_bytes // row_bytes) // 8 * 8)
    two_step = ((n_rows + 1) // 2 + 7) // 8 * 8      # ensures at least 2 grid steps
    return int(min(tile, two_step))


def _clip_quantizer_rowwise(x, target_block_bytes):
    orig_shape = x.shape
    w = int(orig_shape[-1])
    rows = x.size // w
    itemsize = jnp.dtype(x.dtype).itemsize
    x2 = x.reshape(rows, w)

    row_tile = _pick_row_tile(rows, w * itemsize, target_block_bytes)
    grid = pl.cdiv(rows, row_tile)

    out = pl.pallas_call(
        _rowwise_kernel,
        out_shape=jax.ShapeDtypeStruct((rows, w), x.dtype),
        grid_spec=pltpu.PrefetchScalarGridSpec(
            num_scalar_prefetch=0,
            grid=(grid,),
            in_specs=[pl.BlockSpec((row_tile, w), lambda i: (i, 0))],
            out_specs=pl.BlockSpec((row_tile, w), lambda i: (i, 0)),
        ),
        compiler_params=pltpu.CompilerParams(dimension_semantics=("parallel",)),
        cost_estimate=pl.CostEstimate(
            flops=10 * rows * w,
            transcendentals=rows,
            bytes_accessed=2 * rows * w * itemsize),
    )(x2)
    return out.reshape(orig_shape)


def clip_quantizer(x, *, target_block_bytes=1 << 20):
    """Forward of ErfClipQuantizer. x: (..., W); quantization stats over last axis."""
    orig_shape = x.shape
    w = int(orig_shape[-1])
    rows = x.size // w
    itemsize = jnp.dtype(x.dtype).itemsize

    p = 128 // math.gcd(w, 128)      # rows packed per lane-dense row
    pw = p * w
    nseg = p
    onehot_bytes = pw * nseg * 4

    # Guard the robustness cliff: for W with small gcd(W,128) the one-hot
    # matrices get huge; use the simple row-wise kernel instead.
    if onehot_bytes > _MAX_ONEHOT_BYTES:
        return _clip_quantizer_rowwise(x, target_block_bytes)

    # Pack p consecutive reduction rows into one 128-multiple-wide row.
    x2 = x.reshape(rows, w)
    rem = rows % p
    if rem:                           # tiny pad (<= p-1 rows); common case: no pad
        x2 = jnp.pad(x2, ((0, p - rem), (0, 0)))
    packed_rows = x2.shape[0] // p
    xp = x2.reshape(packed_rows, pw)

    row_tile = _pick_row_tile(packed_rows, pw * itemsize, target_block_bytes)
    grid = pl.cdiv(packed_rows, row_tile)     # last block may be partial

    # One-hot segment matrices: lane l belongs to segment l // w.
    lane = lax.broadcasted_iota(jnp.int32, (pw, nseg), 0)
    sid = lax.broadcasted_iota(jnp.int32, (pw, nseg), 1)
    seg_mat = (lane // w == sid).astype(jnp.float32)          # (PW, NSEG)
    seg_mat_t = seg_mat.T                                     # (NSEG, PW)

    kernel = functools.partial(_packed_kernel, seg_width=w)

    n_elem = packed_rows * pw
    out = pl.pallas_call(
        kernel,
        out_shape=jax.ShapeDtypeStruct((packed_rows, pw), x.dtype),
        grid_spec=pltpu.PrefetchScalarGridSpec(
            num_scalar_prefetch=0,
            grid=(grid,),
            in_specs=[
                pl.BlockSpec((row_tile, pw), lambda i: (i, 0)),
                pl.BlockSpec((pw, nseg), lambda i: (0, 0)),   # resident, fetched once
                pl.BlockSpec((nseg, pw), lambda i: (0, 0)),   # resident, fetched once
            ],
            out_specs=pl.BlockSpec((row_tile, pw), lambda i: (i, 0)),
        ),
        compiler_params=pltpu.CompilerParams(
            dimension_semantics=("parallel",)),
        cost_estimate=pl.CostEstimate(
            flops=n_elem * (6 * nseg + 8),
            transcendentals=packed_rows * nseg,
            bytes_accessed=2 * n_elem * itemsize + 2 * onehot_bytes),
    )(xp, seg_mat, seg_mat_t)

    out = out.reshape(packed_rows * p, w)
    if rem:
        out = out[:rows]
    return out.reshape(orig_shape)


def _reference(x):
    xf = x.astype(jnp.float32)
    scale = GAUSS * jnp.sqrt(jnp.mean(xf ** 2, axis=-1, keepdims=True)) + 1e-8
    step = 2.0 * scale / (N_LEVELS - 1)
    x_clip = jnp.clip(xf, -scale, scale)
    xq = jnp.round(x_clip / step + 0.5) * step - 0.5 * step
    return xq.astype(x.dtype)


def _check(x, name):
    y = jax.block_until_ready(clip_quantizer(x))
    ref = _reference(x)
    assert y.shape == x.shape and y.dtype == x.dtype, name
    diff = jnp.abs(y.astype(jnp.float32) - ref.astype(jnp.float32))
    # The reciprocal/rsqrt formulation can differ from divide by a couple of ulps,
    # which may flip round() exactly at a tie and shift a value by one step.
    # Require near-exact agreement everywhere else and bound outliers by one step.
    frac_tight = float(jnp.mean((diff <= 1e-4).astype(jnp.float32)))
    xf = x.astype(jnp.float32)
    scale = GAUSS * jnp.sqrt(jnp.mean(xf ** 2, axis=-1, keepdims=True)) + 1e-8
    step_max = float(jnp.max(2.0 * scale / (N_LEVELS - 1)))
    assert frac_tight >= 0.995, (name, frac_tight)
    assert float(jnp.max(diff)) <= step_max * 1.001 + 1e-6, (name, float(jnp.max(diff)))


if __name__ == "__main__":
    key = jax.random.PRNGKey(0)
    k1, k2, k3 = jax.random.split(key, 3)

    # Main case: NCHW-like activations, W=16 -> packed MXU path, no pad, grid of 2.
    x = jax.random.normal(k1, (2, 4, 16, 16), dtype=jnp.float32)
    _check(x, "packed")

    # Packing remainder (rows % p != 0) + an all-zero row (epsilon-placement check).
    x2 = jax.random.normal(k2, (3, 5, 16), dtype=jnp.float32)
    x2 = x2.at[0, 0, :].set(0.0)
    _check(x2, "packed_pad_zero_row")

    # W with small gcd(W, 128) -> row-wise fallback kernel.
    x3 = jax.random.normal(k3, (4, 8, 250), dtype=jnp.float32)
    _check(x3, "rowwise_fallback")

    print("KERNEL_OK")
</pallas_src>

<mosaic_0001>
module attributes {stable_mosaic.version = 11 : i64} {
  func.func @_packed_kernel(%arg0: i32, %arg1: memref<8x128xf32, #tpu.memory_space<vmem>>, %arg2: memref<128x8xf32, #tpu.memory_space<vmem>>, %arg3: memref<8x128xf32, #tpu.memory_space<vmem>>, %arg4: memref<8x128xf32, #tpu.memory_space<vmem>>) attributes {dimension_semantics = [#tpu.dimension_semantics<parallel>], iteration_bounds = array<i64: 2>, scalar_prefetch = 0 : i64, scratch_operands = 0 : i64, tpu.core_type = #tpu.core_type<tc>, window_params = [{transform_indices = @transform_0, window_bounds = array<i64: 8, 128>}, {pipeline_mode = #tpu.pipeline_mode<synchronous>, transform_indices = @transform_1, window_bounds = array<i64: 128, 8>}, {pipeline_mode = #tpu.pipeline_mode<synchronous>, transform_indices = @transform_2, window_bounds = array<i64: 8, 128>}, {transform_indices = @transform_3, window_bounds = array<i64: 8, 128>}]} {
    %c0 = arith.constant 0 : index
    %c0_0 = arith.constant 0 : index
    %0 = vector.load %arg1[%c0, %c0_0] : memref<8x128xf32, #tpu.memory_space<vmem>>, vector<8x128xf32>
    %1 = arith.mulf %0, %0 : vector<8x128xf32>
    %c0_1 = arith.constant 0 : index
    %c0_2 = arith.constant 0 : index
    %2 = vector.load %arg2[%c0_1, %c0_2] : memref<128x8xf32, #tpu.memory_space<vmem>>, vector<128x8xf32>
    %cst = arith.constant dense<0.000000e+00> : vector<8x8xf32>
    %3 = tpu.matmul %1, %2, %cst {dimension_numbers = #tpu.dot_dimension_numbers<[1], [0], [0], [1], [0, 0, 1, 1], [], []>} : vector<8x128xf32>, vector<128x8xf32>, vector<8x8xf32> -> vector<8x8xf32>
    %cst_3 = arith.constant 6.250000e-02 : f32
    %4 = vector.broadcast %cst_3 : f32 to vector<8x8xf32>
    %5 = arith.mulf %3, %4 : vector<8x8xf32>
    %cst_4 = arith.constant 1.58231677E-17 : f32
    %6 = vector.broadcast %cst_4 : f32 to vector<8x8xf32>
    %7 = arith.addf %5, %6 : vector<8x8xf32>
    %8 = math.rsqrt %7 : vector<8x8xf32>
    %cst_5 = arith.constant 2.98337603 : f32
    %9 = vector.broadcast %cst_5 : f32 to vector<8x8xf32>
    %10 = arith.mulf %9, %8 : vector<8x8xf32>
    %11 = arith.mulf %7, %8 : vector<8x8xf32>
    %cst_6 = arith.constant 0.335190743 : f32
    %12 = vector.broadcast %cst_6 : f32 to vector<8x8xf32>
    %13 = arith.mulf %12, %11 : vector<8x8xf32>
    %c0_7 = arith.constant 0 : index
    %c0_8 = arith.constant 0 : index
    %14 = vector.load %arg3[%c0_7, %c0_8] : memref<8x128xf32, #tpu.memory_space<vmem>>, vector<8x128xf32>
    %cst_9 = arith.constant dense<0.000000e+00> : vector<8x128xf32>
    %15 = tpu.matmul %10, %14, %cst_9 {dimension_numbers = #tpu.dot_dimension_numbers<[1], [0], [0], [1], [0, 0, 1, 1], [], []>} : vector<8x8xf32>, vector<8x128xf32>, vector<8x128xf32> -> vector<8x128xf32>
    %c0_10 = arith.constant 0 : index
    %c0_11 = arith.constant 0 : index
    %16 = vector.load %arg3[%c0_10, %c0_11] : memref<8x128xf32, #tpu.memory_space<vmem>>, vector<8x128xf32>
    %cst_12 = arith.constant dense<0.000000e+00> : vector<8x128xf32>
    %17 = tpu.matmul %13, %16, %cst_12 {dimension_numbers = #tpu.dot_dimension_numbers<[1], [0], [0], [1], [0, 0, 1, 1], [], []>} : vector<8x8xf32>, vector<8x128xf32>, vector<8x128xf32> -> vector<8x128xf32>
    %18 = arith.mulf %0, %15 : vector<8x128xf32>
    %cst_13 = arith.constant -7.500000e+00 : f32
    %cst_14 = arith.constant 7.500000e+00 : f32
    %19 = vector.broadcast %cst_13 : f32 to vector<8x128xf32>
    %20 = arith.maximumf %19, %18 : vector<8x128xf32>
    %21 = vector.broadcast %cst_14 : f32 to vector<8x128xf32>
    %22 = arith.minimumf %21, %20 : vector<8x128xf32>
    %cst_15 = arith.constant 5.000000e-01 : f32
    %23 = vector.broadcast %cst_15 : f32 to vector<8x128xf32>
    %24 = arith.addf %22, %23 : vector<8x128xf32>
    %25 = math.roundeven %24 : vector<8x128xf32>
    %cst_16 = arith.constant 5.000000e-01 : f32
    %26 = vector.broadcast %cst_16 : f32 to vector<8x128xf32>
    %27 = arith.subf %25, %26 : vector<8x128xf32>
    %28 = arith.mulf %27, %17 : vector<8x128xf32>
    %c0_17 = arith.constant 0 : index
    %c0_18 = arith.constant 0 : index
    %29 = vector.load %arg4[%c0_17, %c0_18] : memref<8x128xf32, #tpu.memory_space<vmem>>, vector<8x128xf32>
    tpu.vector_store %arg4[%c0_17, %c0_18], %28 {strides = array<i32>} : memref<8x128xf32, #tpu.memory_space<vmem>>, vector<8x128xf32>,
    return
  }
  func.func @transform_0(%arg0: i32) -> (i32, i32) {
    %c0_i32 = arith.constant 0 : i32
    %c0_i32_0 = arith.constant 0 : i32
    return %arg0, %c0_i32 : i32, i32
  }
  func.func @transform_1(%arg0: i32) -> (i32, i32) {
    %c0_i32 = arith.constant 0 : i32
    %c0_i32_0 = arith.constant 0 : i32
    %c0_i32_1 = arith.constant 0 : i32
    return %c0_i32, %c0_i32_0 : i32, i32
  }
  func.func @transform_2(%arg0: i32) -> (i32, i32) {
    %c0_i32 = arith.constant 0 : i32
    %c0_i32_0 = arith.constant 0 : i32
    %c0_i32_1 = arith.constant 0 : i32
    return %c0_i32, %c0_i32_0 : i32, i32
  }
  func.func @transform_3(%arg0: i32) -> (i32, i32) {
    %c0_i32 = arith.constant 0 : i32
    %c0_i32_0 = arith.constant 0 : i32
    return %arg0, %c0_i32 : i32, i32
  }
}

</mosaic_0001>

<bundles_post_ra>
// kernel: tpu_custom_call.1
= control target key start
LH: loop header
LB: loop body
LE: loop exit
PB: predicated region body
PF: predicated region fallthrough
CT: control target
= control target key end

     0   :  { %8 = vsyncpa [#allocation3], 0  ;;  %s867_s0 = inlined_call_operand.vmem [shape: f32[16,128], index: 0, kind: input, shape index: {}]   ;;  %s868_s1 = inlined_call_operand.vmem [shape: f32[128,8], index: 1, kind: input, shape index: {}]   ;;  %s869_s2 = inlined_call_operand.vmem [shape: f32[8,128], index: 2, kind: input, shape index: {}]   ;;  %s870_s3 = inlined_call_operand.hbm [shape: f32[16,128], index: 3, kind: output, shape index: {}]  }
   0x1   :  { %10 = vsyncpa [#allocation3 + $0x1], 0  ;;  %s705_s12 = smov 0   ;;  %s707_s13 = smov 0  }
   0x2   :  { %s709_s14 = smov 0   ;;  %s711_s15 = smov 0  }
   0x3 LB: > { %s726_s16 = sadd.s32 4294967295, %s680_s15   ;;  %s489_s17 = sadd.s32 4294967294, %s680_s15   ;;  %s680_s15 = sphi %s711_s15, %s876_s15   ;;  %s676_s14 = sphi %s709_s14, %s875_s14   ;;  %s672_s13 = sphi %s707_s13, %s874_s13   ;;  %s668_s12 = sphi %s705_s12, %s873_s12  }
   0x4   : > { %s730_s18 = sadd.s32 1, %s680_s15   ;;  %s91_s19 = sadd.s32 1, %s676_s14 }
   0x5   : > { %s88_s20 = ssub.s32 %s680_s15, %s730_s18  ;;  %p101_p0 = scmp.ne.s32.totalorder %s676_s14, %s672_s13 }
   0x6   : > { %p89_p1 = scmp.eq.s32.totalorder %s88_s20, 0  ;;  %p102_p2 = scmp.eq.s32.totalorder %s726_s16, 1 }
   0x7   : > { %p107_p3 = scmp.ne.s32.totalorder %s672_s13, %s668_s12  ;;  %p108_p4 = scmp.eq.s32.totalorder %s489_s17, 1 }
   0x8   : > { %s741_s21 = scalar_select %p89_p1, %s676_s14, %s91_s19  }
   0x9   : > { %p743_p5 = por %p102_p2, %p101_p0  ;;  %p747_p6 = por %p108_p4, %p107_p3 }
   0xa   : > { %p492_p7 = scmp.ge.s32.totalorder %s680_s15, 1  ;;  %p139_p8 = scmp.lt.s32.totalorder %s680_s15, 3 }
   0xc   : > { %p140_p9 = pnand %p492_p7, %p139_p8 }
   0xd   : > { %p162_p10 = scmp.lt.s32.totalorder (!%p140_p9), %s726_s16, 1  ;;  %s159_s27 = sand.u32 (!%p140_p9), 1, %s672_s13  }
   0xe   : > { %143 = sbr.rel (%p140_p9) target bundleno = 490 (0x1ea), region = 32  ;;  %s493_s28 = sshll.u32 (!%p140_p9), %s159_s27, 3 }
   0xf   : > { %s161_s30 = scalar_lea.vmem (!%p140_p9), [#allocation2], %s493_s28  ;;  %s417_s8 = scalar_lea.sflag (!%p140_p9), [#allocation3], %s159_s27 }
  0x10   : > { %s430_s4 = sshll.u32 (!%p140_p9), %s161_s30, 4  ;;  %s684_s10 = smov (!%p140_p9), [#allocation2]   ;;  %s431_s4 = int_to_ptr.vmem [resolvable:$true] %s430_s4 }
  0x11   : > { %s624_s11 = sshll.u32 (!%p140_p9), %s684_s10, 4  ;;  %s625_s11 = int_to_ptr.vmem [resolvable:$false] %s624_s11 }
  0x12   : > { %p627_p0 = scmp.lt.s32.totalorder (!%p140_p9), %s431_s4, %s625_s11 }
  0x13   : > { %v183_v0 = vld [vmem:[%s868_s1 + $0x78] sm:$0xff]  ;;  %v682_v1 = vmov 0.0   ;;  %v182_v2 = vld [vmem:[%s868_s1 + $0x70] sm:$0xff]  ;;  %vm683_vm0 = vmmov 0   ;;  %v181_v3 = vld [vmem:[%s868_s1 + $0x68] sm:$0xff]  ;;  %s163_s24 = scalar_select %p162_p10, %s726_s16, 1 }
  0x14   : > { %524 = vmatprep.subr.mxu0 %v682_v1  ;;  %556 = vmatprep.mubr.msk.f32.mxu0 %vm683_vm0, %v682_v1  ;;  %v180_v4 = vld [vmem:[%s868_s1 + $0x60] sm:$0xff]  ;;  %v179_v5 = vld [vmem:[%s868_s1 + $0x58] sm:$0xff]  ;;  %v178_v6 = vld [vmem:[%s868_s1 + $0x50] sm:$0xff]  ;;  %vm261_vm1 = vcmask 64512  }
  0x15   : > { %525 = vmatpush3.msra.mxu0 %v183_v0  ;;  %559 = vmatprep.subr.mxu1 %v682_v1  ;;  %v177_v7 = vld [vmem:[%s868_s1 + $0x48] sm:$0xff]  ;;  %v176_v8 = vld [vmem:[%s868_s1 + $0x40] sm:$0xff]  ;;  %v175_v9 = vld [vmem:[%s868_s1 + $0x38] sm:$0xff]  ;;  %s494_s29 = sshll.u32 %s163_s24, 3 }
  0x16   : > { %526 = vmatprep.subr.mxu0 %v682_v1  ;;  %561 = vmatprep.mubr.msk.f32.mxu1 %vm683_vm0, %v682_v1  ;;  %v174_v10 = vld [vmem:[%s868_s1 + $0x30] sm:$0xff]  ;;  %v173_v11 = vld [vmem:[%s868_s1 + $0x28] sm:$0xff]  ;;  %v172_v12 = vld [vmem:[%s868_s1 + $0x20] sm:$0xff]  ;;  %s165_s9 = scalar_lea.vmem %s867_s0, %s494_s29  ;;  %s500_s29 = sshll.u32 %s726_s16, 7 }
  0x17   : > { %527 = vmatpush3.msra.mxu0 %v182_v2  ;;  %v171_v13 = vld [vmem:[%s868_s1 + $0x18] sm:$0xff]  ;;  %v170_v14 = vld [vmem:[%s868_s1 + $0x10] sm:$0xff]  ;;  %v166_v15 = vld [vmem:[%s165_s9] sm:$0xff]  ;;  %s428_s7 = scalar_lea.hbm %s870_s3, %s500_s29  ;;  %s620_s9 = scalar_lea.vmem %s431_s4, 128 }
  0x18   : > { %528 = vmatprep.subr.mxu0 %v682_v1  ;;  %v169_v16 = vld [vmem:[%s868_s1 + $0x8] sm:$0xff]  ;;  %v168_v17 = vld [vmem:[%s868_s1] sm:$0xff]  ;;  %v167_v18 = vmul.f32 %v166_v15, %v166_v15  ;;  %p621_p11 = scmp.ne.s32.totalorder %s431_s4, %s620_s9  ;;  %s626_s16 = scalar_lea.vmem %s625_s11, 256 }
  0x19   : > { %529 = vmatpush3.msra.mxu0 %v181_v3  ;;  %v260_v19 = vld [vmem:[%s869_s2] sm:$0xff]  ;;  %p628_p1 = scmp.lt.s32.totalorder %s626_s16, %s620_s9 }
  0x1a   : > { %530 = vmatprep.subr.mxu0 %v682_v1  ;;  %560 = vmatpush3.msra.mxu1 %v260_v19  ;;  %p622_p12 = pnand %p621_p11, %p743_p5 }
  0x1b   : > { %531 = vmatpush3.msra.mxu0 %v180_v4  ;;  %564 = vmatprep.subr.mxu1 %v682_v1  ;;  %p629_p2 = por %p628_p1, %p627_p0 }
  0x1c   : > { %532 = vmatprep.subr.mxu0 %v682_v1  ;;  %p623_p13 = pneg %p622_p12 }
  0x1d   : > { %533 = vmatpush3.msra.mxu0 %v179_v5 }
  0x1e   : > { %534 = vmatprep.subr.mxu0 %v682_v1  ;;  %p630_p3 = pnand %p629_p2, %p623_p13 }
  0x1f   : > { %535 = vmatpush3.msra.mxu0 %v178_v6 }
  0x20   : > { %536 = vmatprep.subr.mxu0 %v682_v1 }
  0x21   : > { %537 = vmatpush3.msra.mxu0 %v177_v7 }
  0x22   : > { %538 = vmatprep.subr.mxu0 %v682_v1 }
  0x23   : > { %539 = vmatpush3.msra.mxu0 %v176_v8 }
  0x24   : > { %540 = vmatprep.subr.mxu0 %v682_v1 }
  0x25   : > { %541 = vmatpush3.msra.mxu0 %v175_v9 }
  0x26   : > { %542 = vmatprep.subr.mxu0 %v682_v1 }
  0x27   : > { %543 = vmatpush3.msra.mxu0 %v174_v10 }
  0x28   : > { %544 = vmatprep.subr.mxu0 %v682_v1 }
  0x29   : > { %545 = vmatpush3.msra.mxu0 %v173_v11 }
  0x2a   : > { %546 = vmatprep.subr.mxu0 %v682_v1 }
  0x2b   : > { %547 = vmatpush3.msra.mxu0 %v172_v12 }
  0x2c   : > { %548 = vmatprep.subr.mxu0 %v682_v1 }
  0x2d   : > { %549 = vmatpush3.msra.mxu0 %v171_v13 }
  0x2e   : > { %550 = vmatprep.subr.mxu0 %v682_v1 }
  0x2f   : > { %551 = vmatpush3.msra.mxu0 %v170_v14 }
  0x30   : > { %552 = vmatprep.subr.mxu0 %v682_v1 }
  0x31   : > { %553 = vmatpush3.msra.mxu0 %v169_v16 }
  0x32   : > { %554 = vmatprep.subr.mxu0 %v682_v1 }
  0x33   : > { %555 = vmatpush3.msra.mxu0 %v168_v17 }
  0x34   : > { %557 = vmatmul.mubr.f32.vlgmr.msra.gmra.mxu0 %v167_v18 }
  0xf4   : > { %v250_v20 = vpop.f32.mrf.mxu0 }
  0xf5   : > { %v254_v21 = vmul.f32 0.0625, %v250_v20 }
  0xf6   : > { %v558_v22 = vpop.f32.mrf.mxu0 }
  0xf7   : > { %v255_v23 = vadd.f32 1.5823168e-17, %v254_v21 }
  0xf9   : > { %618 = vrsqrt.f32 %v255_v23 }
 0x106   : > { %v619_v24 = vpop.eup %618 }
 0x107   : > { %v258_v25 = vmul.f32 %v619_v24, %v255_v23  ;;  %v257_v26 = vmul.f32 2.983376, %v619_v24 }
 0x109   : > { %562 = vmatmul.mubr.msk.f32.vlgmr.msra.gmra.mxu1 %vm261_vm1, %v257_v26  ;;  %v259_v27 = vmul.f32 0.33519074, %v258_v25 }
 0x10a   : > { %565 = vmatpush3.msra.mxu1 %v260_v19  ;;  %566 = vmatprep.mubr.msk.f32.mxu1 %vm683_vm0, %v682_v1 }
 0x10d   : > { %567 = vmatmul.mubr.msk.f32.vlgmr.msra.gmra.mxu1 %vm261_vm1, %v259_v27 }
 0x1c9   : > { %v331_v28 = vpop.f32.mrf.mxu1 }
 0x1ca   : > { %v408_v29 = vmul.f32 %v331_v28, %v166_v15 }
 0x1cb   : > { %v563_v30 = vpop.f32.mrf.mxu1 }
 0x1cc   : > { %v497_v31 = vclamps-f32 %v408_v29, 7.5 }
 0x1cd   : > { %v404_v32 = vpop.f32.mrf.mxu1 }
 0x1ce   : > { %v411_v33 = vadd.f32 0.5, %v497_v31 }
 0x1cf   : > { %v568_v34 = vpop.f32.mrf.mxu1 }
 0x1d0   : > { %v571_v35 = vcvt.f32.s32 %v411_v33  ;;  %v569_v37 = vand.u32 2147483647, %v411_v33  ;;  %v574_v39 = vand.u32 2147483648, %v411_v33 }
 0x1d2   : > { %v572_v36 = vcvt.s32.f32 %v571_v35  ;;  %vm570_vm2 = vcmp.lt.f32.partialorder %v569_v37, 8388608.0 }
 0x1d4   : > { %v573_v38 = vand.u32 2147483647, %v572_v36 }
 0x1d6   : > { %v575_v40 = vor.u32 %v574_v39, %v573_v38 }
 0x1d8   : > { %v576_v41 = vsel %vm570_vm2, %v575_v40, %v411_v33 }
 0x1d9   : > { %v498_v42 = vadd.f32 -0.5, %v576_v41 }
 0x1db   : > { %v414_v43 = vmul.f32 %v498_v42, %v404_v32 }
 0x1dd   : > { %415 = vst [vmem:[%s161_s30] sm:$0xff] %v414_v43 }
 0x1de   : > { %633 = shalt.err (!%p630_p3)
}
 0x1df   : > { %s634_s17 = scalar_lea.hbm %s428_s7, 128  ;;  %s638_s24 = scalar_lea.hbm %s870_s3, 256 }
 0x1e0   : > { %p635_p4 = scmp.ne.s32.totalorder %s428_s7, %s634_s17  ;;  %p639_p9 = scmp.lt.s32.totalorder %s428_s7, %s870_s3 }
 0x1e1   : > { %p640_p10 = scmp.lt.s32.totalorder %s638_s24, %s634_s17 }
 0x1e2   : > { %p636_p7 = pnand %p635_p4, %p743_p5 }
 0x1e3   : > { %p641_p11 = por %p640_p10, %p639_p9 }
 0x1e4   : > { %p637_p8 = pneg %p636_p7 }
 0x1e6   : > { %p642_p12 = pnand %p641_p11, %p637_p8 }
 0x1e8   : > { %645 = shalt.err (!%p642_p12)
}
 0x1e9   : > { %577 = dma.vmem_to_hbm [thread:$0]  (%p743_p5), %s431_s4, 128, %s428_s7, %s417_s8  }
 0x1ea PF: > { %p583_p13 = scmp.ge.s32.totalorder %s680_s15, 2  ;;  %s442_s27 = sand.u32 1, %s668_s12  }
 0x1eb   : > { %s443_s28 = scalar_lea.sflag [#allocation3], %s442_s27 }
 0x1ec   : > { %p580_p0 = pnand %p583_p13, %p747_p6 }
 0x1ee   : > { %p581_p1 = pneg %p580_p0 }
 0x1f0   : > { %663 = dma.done.wait (%p581_p1), %s443_s28, 128  }
 0x1f1   : > { %665 = vsyncadd (%p581_p1), %s443_s28, 4294967168  ;;  %p13_p2 = scmp.ge.s32.totalorder %s730_s18, 4   ;;  %s873_s12 = smov %s672_s13 }
 0x1f2   : > { %s874_s13 = smov %s676_s14  ;;  %s875_s14 = smov %s741_s21 }
 0x1f3   : > { %s876_s15 = smov %s730_s18  ;;  %15 = sbr.rel (!%p13_p2) target bundleno = 3 (0x3), region = 67 }
 0x1f8   :  { %448 = vsyncpa [#allocation3], 1 }
 0x1f9   :  { %450 = vsyncpa [#allocation3 + $0x1], 1 }

</bundles_post_ra>
